<compile_context>
chip_gen: v7x
topology: tpu7x:2x2x1
jax: 0.10.0
libtpu: 0.0.40
codegen_flags: <defaults>
</compile_context>

<pallas_src>
import functools

import jax
import jax.numpy as jnp
from jax.experimental import pallas as pl
from jax.experimental.pallas import tpu as pltpu

# ------------------------------- configuration -------------------------------
B = 2                     # example batch
IN_DIM = 64               # EqualLinear in_dim
OUT_DIM = 128             # EqualLinear out_dim (multiple of 128 -> lane dense)
D1 = IN_DIM * 3           # 192  (Flatten width, input is [B, 3, IN_DIM])
D2 = IN_DIM * 2           # 128
PAD = 128                 # padded width for the 64-wide dims
SLOPE = 0.2               # LeakyReLU negative slope

# Packed weight-slab row offsets (all multiples of 16 -> bf16 sublane aligned).
R1 = 0                    # w1: [192, 128]
R2 = R1 + D1              # w2: [128, 128]
R3 = R2 + D2              # w3: [128, 128]  (cols 64..128 zero-padded)
R4 = R3 + D2              # w4: [128, 128]  (rows 64..128 zero-padded)
R5 = R4 + PAD             # w5: [128, 128]
W_ROWS = R5 + OUT_DIM     # 704 total rows
B_ROWS = 8                # bias slab [8, 128] f32 (rows 0..4 real, 5..7 zero)


# ================================ Pallas kernel ===============================
def _equal_linear_kernel(x_ref, w_ref, b_ref, o_ref):
    """Fused 5-layer MLP, LeakyReLU(0.2) between layers (none after fc5).

    x_ref : [TM, 192] f32           (flattened, M padded to a multiple of 8)
    w_ref : [704, 128] bf16         (packed, zero-padded weight slab)
    b_ref : [8, 128]  f32           (packed bias slab)
    o_ref : [TM, 128] f32
    """

    def dense(h, row0, rows, b_row):
        w = w_ref[row0:row0 + rows, :]            # static slice, bf16 in VMEM
        b = b_ref[b_row:b_row + 1, :]             # [1, 128] f32
        return jnp.dot(h.astype(jnp.bfloat16), w,
                       preferred_element_type=jnp.float32) + b

    def lrelu(v):                                 # mul + max, no select mask
        return jnp.maximum(v, SLOPE * v)

    h = x_ref[...].astype(jnp.float32)            # [TM, 192]
    h = lrelu(dense(h, R1, D1, 0))                # fc1 -> [TM, 128]
    h = lrelu(dense(h, R2, D2, 1))                # fc2 -> [TM, 128]
    h = lrelu(dense(h, R3, D2, 2))                # fc3 -> [TM, 128] (64 real lanes)
    h = lrelu(dense(h, R4, PAD, 3))               # fc4 -> [TM, 128]
    h = dense(h, R5, OUT_DIM, 4)                  # fc5 -> [TM, 128], no activation
    o_ref[...] = h.astype(o_ref.dtype)


# ================================ JAX wrapper =================================
def _round_up(n, m):
    return ((n + m - 1) // m) * m


def equal_linear_forward(x, w_packed, b_packed, *, tile_m=256):
    """x: [B, 3, IN_DIM] -> [B, OUT_DIM].  Mirrors EqualLinear.forward."""
    bsz = x.shape[0]
    x2d = x.reshape(bsz, -1).astype(jnp.float32)  # nn.Flatten
    assert x2d.shape[1] == D1

    if bsz <= tile_m:
        # Small batch: one gridless call, M padded to a multiple of 8.
        m_pad = _round_up(max(bsz, 8), 8)
        x_p = jnp.pad(x2d, ((0, m_pad - bsz), (0, 0)))
        vmem = pl.BlockSpec(memory_space=pltpu.MemorySpace.VMEM)
        out = pl.pallas_call(
            _equal_linear_kernel,
            out_shape=jax.ShapeDtypeStruct((m_pad, OUT_DIM), jnp.float32),
            in_specs=[vmem, vmem, vmem],
            out_specs=vmem,
        )(x_p, w_packed, b_packed)
    else:
        # Large batch: tile M over a grid; weights/biases stay VMEM-resident
        # (constant index_map); M axis is "parallel" for megacore (v7x).
        m_pad = _round_up(bsz, tile_m)
        x_p = jnp.pad(x2d, ((0, m_pad - bsz), (0, 0)))
        out = pl.pallas_call(
            _equal_linear_kernel,
            out_shape=jax.ShapeDtypeStruct((m_pad, OUT_DIM), jnp.float32),
            grid=(m_pad // tile_m,),
            in_specs=[
                pl.BlockSpec((tile_m, D1), lambda i: (i, 0)),
                pl.BlockSpec((W_ROWS, OUT_DIM), lambda i: (0, 0)),
                pl.BlockSpec((B_ROWS, OUT_DIM), lambda i: (0, 0)),
            ],
            out_specs=pl.BlockSpec((tile_m, OUT_DIM), lambda i: (i, 0)),
            compiler_params=pltpu.CompilerParams(
                dimension_semantics=("parallel",)),
        )(x_p, w_packed, b_packed)

    return out[:bsz]


# ============================ deterministic params ============================
def init_params(key):
    """PyTorch nn.Linear default init: U(-1/sqrt(fan_in), 1/sqrt(fan_in))."""
    layer_dims = [(D1, D2), (D2, D2), (D2, IN_DIM), (IN_DIM, OUT_DIM),
                  (OUT_DIM, OUT_DIM)]
    ks = jax.random.split(key, 2 * len(layer_dims))
    params = {}
    for idx, (fan_in, fan_out) in enumerate(layer_dims):
        bound = 1.0 / float(fan_in) ** 0.5
        params[f"w{idx + 1}"] = jax.random.uniform(
            ks[2 * idx], (fan_in, fan_out), minval=-bound, maxval=bound,
            dtype=jnp.float32)
        params[f"b{idx + 1}"] = jax.random.uniform(
            ks[2 * idx + 1], (1, fan_out), minval=-bound, maxval=bound,
            dtype=jnp.float32)
    return params


def pack_params(params):
    """Pack 5 weights into one bf16 [704,128] slab; 5 biases into f32 [8,128]."""
    w1 = params["w1"]                                                 # [192,128]
    w2 = params["w2"]                                                 # [128,128]
    w3 = jnp.pad(params["w3"], ((0, 0), (0, PAD - IN_DIM)))           # [128,128]
    w4 = jnp.pad(params["w4"], ((0, PAD - IN_DIM), (0, 0)))           # [128,128]
    w5 = params["w5"]                                                 # [128,128]
    w_packed = jnp.concatenate([w1, w2, w3, w4, w5], axis=0).astype(jnp.bfloat16)

    b3 = jnp.pad(params["b3"], ((0, 0), (0, PAD - IN_DIM)))           # [1,128]
    b_rows = jnp.concatenate(
        [params["b1"], params["b2"], b3, params["b4"], params["b5"]], axis=0)
    b_packed = jnp.pad(b_rows, ((0, B_ROWS - 5), (0, 0))).astype(jnp.float32)

    assert w_packed.shape == (W_ROWS, OUT_DIM)
    assert b_packed.shape == (B_ROWS, OUT_DIM)
    return w_packed, b_packed


# ================================ pure-JAX ref ================================
def reference_forward(x, params):
    """Same math as the kernel (bf16 operands at the dot, f32 accum/elementwise)."""
    h = x.reshape(x.shape[0], -1).astype(jnp.float32)
    for i in range(1, 6):
        w = params[f"w{i}"].astype(jnp.bfloat16)
        h = jnp.dot(h.astype(jnp.bfloat16), w,
                    preferred_element_type=jnp.float32) + params[f"b{i}"]
        if i < 5:
            h = jnp.maximum(h, SLOPE * h)
    return h


# ==================================== main ====================================
if __name__ == "__main__":
    key = jax.random.PRNGKey(0)
    kx, kp, kb = jax.random.split(key, 3)

    params = init_params(kp)
    w_packed, b_packed = pack_params(params)

    fwd = jax.jit(functools.partial(equal_linear_forward,
                                    w_packed=w_packed, b_packed=b_packed))

    # Small-batch path (gridless call, M padded 2 -> 8).
    x_small = jax.random.normal(kx, (B, 3, IN_DIM), dtype=jnp.float32)
    out_small = fwd(x_small)
    jax.block_until_ready(out_small)

    # Larger-batch path (grid over 256-row M tiles, weights VMEM-resident).
    x_big = jax.random.normal(kb, (512, 3, IN_DIM), dtype=jnp.float32)
    out_big = fwd(x_big)
    jax.block_until_ready(out_big)

    ref_small = reference_forward(x_small, params)
    ref_big = reference_forward(x_big, params)

    assert out_small.shape == (B, OUT_DIM) and out_small.dtype == jnp.float32
    assert out_big.shape == (512, OUT_DIM)
    assert bool(jnp.all(jnp.isfinite(out_small)))
    assert bool(jnp.all(jnp.isfinite(out_big)))
    assert bool(jnp.allclose(out_small, ref_small, rtol=1e-2, atol=1e-2))
    assert bool(jnp.allclose(out_big, ref_big, rtol=1e-2, atol=1e-2))
    print("KERNEL_OK")
</pallas_src>

<mosaic_0001>
module attributes {stable_mosaic.version = 11 : i64} {
  func.func @_equal_linear_kernel(%arg0: memref<8x192xf32, #tpu.memory_space<vmem>>, %arg1: memref<704x128xbf16, #tpu.memory_space<vmem>>, %arg2: memref<8x128xf32, #tpu.memory_space<vmem>>, %arg3: memref<8x128xf32, #tpu.memory_space<vmem>>) attributes {dimension_semantics = [], scalar_prefetch = 0 : i64, scratch_operands = 0 : i64, tpu.core_type = #tpu.core_type<tc>} {
    %c0 = arith.constant 0 : index
    %c0_0 = arith.constant 0 : index
    %0 = vector.load %arg0[%c0, %c0_0] : memref<8x192xf32, #tpu.memory_space<vmem>>, vector<8x192xf32>
    %c0_1 = arith.constant 0 : index
    %c0_2 = arith.constant 0 : index
    %1 = vector.load %arg1[%c0_1, %c0_2] : memref<704x128xbf16, #tpu.memory_space<vmem>>, vector<192x128xbf16>
    %c0_3 = arith.constant 0 : index
    %c0_4 = arith.constant 0 : index
    %2 = vector.load %arg2[%c0_3, %c0_4] : memref<8x128xf32, #tpu.memory_space<vmem>>, vector<1x128xf32>
    %3 = arith.truncf %0 : vector<8x192xf32> to vector<8x192xbf16>
    %cst = arith.constant dense<0.000000e+00> : vector<8x128xf32>
    %4 = tpu.matmul %3, %1, %cst {dimension_numbers = #tpu.dot_dimension_numbers<[1], [0], [0], [1], [0, 0, 1, 1], [], []>} : vector<8x192xbf16>, vector<192x128xbf16>, vector<8x128xf32> -> vector<8x128xf32>
    %5 = vector.broadcast %2 : vector<1x128xf32> to vector<8x128xf32>
    %6 = arith.addf %4, %5 : vector<8x128xf32>
    %cst_5 = arith.constant 2.000000e-01 : f32
    %7 = vector.broadcast %cst_5 : f32 to vector<8x128xf32>
    %8 = arith.mulf %7, %6 : vector<8x128xf32>
    %9 = arith.maximumf %6, %8 : vector<8x128xf32>
    %c192 = arith.constant 192 : index
    %c0_6 = arith.constant 0 : index
    %10 = vector.load %arg1[%c192, %c0_6] : memref<704x128xbf16, #tpu.memory_space<vmem>>, vector<128x128xbf16>
    %c1 = arith.constant 1 : index
    %c0_7 = arith.constant 0 : index
    %11 = vector.load %arg2[%c1, %c0_7] : memref<8x128xf32, #tpu.memory_space<vmem>>, vector<1x128xf32>
    %12 = arith.truncf %9 : vector<8x128xf32> to vector<8x128xbf16>
    %cst_8 = arith.constant dense<0.000000e+00> : vector<8x128xf32>
    %13 = tpu.matmul %12, %10, %cst_8 {dimension_numbers = #tpu.dot_dimension_numbers<[1], [0], [0], [1], [0, 0, 1, 1], [], []>} : vector<8x128xbf16>, vector<128x128xbf16>, vector<8x128xf32> -> vector<8x128xf32>
    %14 = vector.broadcast %11 : vector<1x128xf32> to vector<8x128xf32>
    %15 = arith.addf %13, %14 : vector<8x128xf32>
    %cst_9 = arith.constant 2.000000e-01 : f32
    %16 = vector.broadcast %cst_9 : f32 to vector<8x128xf32>
    %17 = arith.mulf %16, %15 : vector<8x128xf32>
    %18 = arith.maximumf %15, %17 : vector<8x128xf32>
    %c320 = arith.constant 320 : index
    %c0_10 = arith.constant 0 : index
    %19 = vector.load %arg1[%c320, %c0_10] : memref<704x128xbf16, #tpu.memory_space<vmem>>, vector<128x128xbf16>
    %c2 = arith.constant 2 : index
    %c0_11 = arith.constant 0 : index
    %20 = vector.load %arg2[%c2, %c0_11] : memref<8x128xf32, #tpu.memory_space<vmem>>, vector<1x128xf32>
    %21 = arith.truncf %18 : vector<8x128xf32> to vector<8x128xbf16>
    %cst_12 = arith.constant dense<0.000000e+00> : vector<8x128xf32>
    %22 = tpu.matmul %21, %19, %cst_12 {dimension_numbers = #tpu.dot_dimension_numbers<[1], [0], [0], [1], [0, 0, 1, 1], [], []>} : vector<8x128xbf16>, vector<128x128xbf16>, vector<8x128xf32> -> vector<8x128xf32>
    %23 = vector.broadcast %20 : vector<1x128xf32> to vector<8x128xf32>
    %24 = arith.addf %22, %23 : vector<8x128xf32>
    %cst_13 = arith.constant 2.000000e-01 : f32
    %25 = vector.broadcast %cst_13 : f32 to vector<8x128xf32>
    %26 = arith.mulf %25, %24 : vector<8x128xf32>
    %27 = arith.maximumf %24, %26 : vector<8x128xf32>
    %c448 = arith.constant 448 : index
    %c0_14 = arith.constant 0 : index
    %28 = vector.load %arg1[%c448, %c0_14] : memref<704x128xbf16, #tpu.memory_space<vmem>>, vector<128x128xbf16>
    %c3 = arith.constant 3 : index
    %c0_15 = arith.constant 0 : index
    %29 = vector.load %arg2[%c3, %c0_15] : memref<8x128xf32, #tpu.memory_space<vmem>>, vector<1x128xf32>
    %30 = arith.truncf %27 : vector<8x128xf32> to vector<8x128xbf16>
    %cst_16 = arith.constant dense<0.000000e+00> : vector<8x128xf32>
    %31 = tpu.matmul %30, %28, %cst_16 {dimension_numbers = #tpu.dot_dimension_numbers<[1], [0], [0], [1], [0, 0, 1, 1], [], []>} : vector<8x128xbf16>, vector<128x128xbf16>, vector<8x128xf32> -> vector<8x128xf32>
    %32 = vector.broadcast %29 : vector<1x128xf32> to vector<8x128xf32>
    %33 = arith.addf %31, %32 : vector<8x128xf32>
    %cst_17 = arith.constant 2.000000e-01 : f32
    %34 = vector.broadcast %cst_17 : f32 to vector<8x128xf32>
    %35 = arith.mulf %34, %33 : vector<8x128xf32>
    %36 = arith.maximumf %33, %35 : vector<8x128xf32>
    %c576 = arith.constant 576 : index
    %c0_18 = arith.constant 0 : index
    %37 = vector.load %arg1[%c576, %c0_18] : memref<704x128xbf16, #tpu.memory_space<vmem>>, vector<128x128xbf16>
    %c4 = arith.constant 4 : index
    %c0_19 = arith.constant 0 : index
    %38 = vector.load %arg2[%c4, %c0_19] : memref<8x128xf32, #tpu.memory_space<vmem>>, vector<1x128xf32>
    %39 = arith.truncf %36 : vector<8x128xf32> to vector<8x128xbf16>
    %cst_20 = arith.constant dense<0.000000e+00> : vector<8x128xf32>
    %40 = tpu.matmul %39, %37, %cst_20 {dimension_numbers = #tpu.dot_dimension_numbers<[1], [0], [0], [1], [0, 0, 1, 1], [], []>} : vector<8x128xbf16>, vector<128x128xbf16>, vector<8x128xf32> -> vector<8x128xf32>
    %41 = vector.broadcast %38 : vector<1x128xf32> to vector<8x128xf32>
    %42 = arith.addf %40, %41 : vector<8x128xf32>
    %c0_21 = arith.constant 0 : index
    %c0_22 = arith.constant 0 : index
    %43 = vector.load %arg3[%c0_21, %c0_22] : memref<8x128xf32, #tpu.memory_space<vmem>>, vector<8x128xf32>
    tpu.vector_store %arg3[%c0_21, %c0_22], %42 {strides = array<i32>} : memref<8x128xf32, #tpu.memory_space<vmem>>, vector<8x128xf32>,
    return
  }
}

</mosaic_0001>

<bundles_post_ra>
// kernel: equal_linear_forward.1
= control target key start
LH: loop header
LB: loop body
LE: loop exit
PB: predicated region body
PF: predicated region fallthrough
CT: control target
= control target key end

     0   :  { %8 = vsyncpa [#allocation3], 0  ;;  %s872_s12 = smov [#allocation2]   ;;  %s974_s0 = inlined_call_operand.vmem [shape: f32[8,192], index: 0, kind: input, shape index: {}]   ;;  %s975_s1 = inlined_call_operand.hbm [shape: bf16[704,128], index: 1, kind: input, shape index: {}]   ;;  %s976_s2 = inlined_call_operand.vmem [shape: f32[8,128], index: 2, kind: input, shape index: {}]   ;;  %s977_s3 = inlined_call_operand.vmem [shape: f32[8,128], index: 3, kind: output, shape index: {}]  }
   0x1   :  { %s16_s13 = sshll.u32 %s872_s12, 4  ;;  %s848_s16 = scalar_lea.hbm %s975_s1, 5632  ;;  %s17_s13 = int_to_ptr.vmem [resolvable:$true] %s16_s13 }
   0x2   :  { %p849_p0 = scmp.ne.s32.totalorder %s975_s1, %s848_s16  ;;  %p852_p1 = scmp.lt.u32.totalorder %s848_s16, %s975_s1 }
   0x4   :  { %p854_p2 = pnand %p852_p1, %p849_p0 }
   0x6   :  { %857 = shalt.err (!%p854_p2)
}
   0x7   :  { %s858_s21 = scalar_lea.vmem %s17_s13, 5632  ;;  %p863_p4 = scmp.lt.s32.totalorder %s17_s13, %s17_s13 }
   0x8   :  { %p859_p3 = scmp.ne.s32.totalorder %s17_s13, %s858_s21  ;;  %p864_p5 = scmp.lt.s32.totalorder %s858_s21, %s858_s21 }
   0xa   :  { %p865_p6 = por %p864_p5, %p863_p4 }
   0xc   :  { %p866_p7 = pnand %p865_p6, %p859_p3 }
   0xe   :  { %869 = shalt.err (!%p866_p7)
}
   0xf   :  { %s873_s22 = smov 64   ;;  %s874_s23 = smov 4  }
  0x10   :  { %22 = dma.hbm_to_vmem [thread:$0]  %s975_s1, 5632, %s17_s13, [#allocation3], %s873_s22, %s873_s22, %s874_s23  }
  0x11   :  { %870 = dma.done.wait [#allocation3], 5632  }
  0x12   :  { %871 = vsyncadd [#allocation3], 4294961664  ;;  %v875_v0 = vmov 0   ;;  %v876_v1 = vmov 0.0   ;;  %v804_v2 = vld [vmem:[#allocation2] sm:$0xff]   ;;  %v805_v3 = vld [vmem:[#allocation2 + $0x8] sm:$0xff]  }
  0x13   :  { %138 = vmatprep.subr.bf16.mxu0 %v875_v0  ;;  %718 = vmatprep.subr.bf16.mxu1 %v876_v1  ;;  %v806_v4 = vld [vmem:[#allocation2 + $0x10] sm:$0xff]   ;;  %v807_v5 = vld [vmem:[#allocation2 + $0x18] sm:$0xff]   ;;  %v30_v6 = vld [vmem:[%s974_s0 + $0x8] sm:$0xff]  ;;  %vm134_vm0 = vcmask 523264   ;;  %vm877_vm1 = vmmov 0  }
  0x14   :  { %139 = vmatpush1.bf16.msra.mxu0 %v804_v2  ;;  %v57_v7 = vpack.c.bf16 %v30_v6, %v30_v6  ;;  %v816_v8 = vld [vmem:[#allocation2 + $0x60] sm:$0xff]   ;;  %v817_v10 = vld [vmem:[#allocation2 + $0x68] sm:$0xff]   ;;  %v818_v12 = vld [vmem:[#allocation2 + $0x70] sm:$0xff]   ;;  %734 = vmatprep.mubr.msk.bf16.mxu1 %vm877_vm1, %v876_v1 }
  0x15   :  { %140 = vmatprep.subr.bf16.mxu0 %v875_v0  ;;  %v808_v9 = vld [vmem:[#allocation2 + $0x20] sm:$0xff]   ;;  %719 = vmatpush3.bf16.msra.mxu1 %v816_v8  ;;  %v809_v11 = vld [vmem:[#allocation2 + $0x28] sm:$0xff]   ;;  %v810_v13 = vld [vmem:[#allocation2 + $0x30] sm:$0xff]  }
  0x16   :  { %645 = vmatprep.mubr.msk.bf16.mxu0 %vm134_vm0, %v57_v7  ;;  %720 = vmatprep.subr.bf16.mxu1 %v876_v1  ;;  %v819_v14 = vld [vmem:[#allocation2 + $0x78] sm:$0xff]   ;;  %v820_v16 = vld [vmem:[#allocation2 + $0x80] sm:$0xff]   ;;  %v821_v18 = vld [vmem:[#allocation2 + $0x88] sm:$0xff]  }
  0x17   :  { %v811_v15 = vld [vmem:[#allocation2 + $0x38] sm:$0xff]   ;;  %v812_v17 = vld [vmem:[#allocation2 + $0x40] sm:$0xff]   ;;  %v813_v19 = vld [vmem:[#allocation2 + $0x48] sm:$0xff]  }
  0x18   :  { %141 = vmatpush1.bf16.msra.mxu0 %v805_v3  ;;  %v814_v20 = vld [vmem:[#allocation2 + $0x50] sm:$0xff]   ;;  %v815_v21 = vld [vmem:[#allocation2 + $0x58] sm:$0xff]   ;;  %v29_v22 = vld [vmem:[%s974_s0] sm:$0xff] }
  0x19   :  { %142 = vmatprep.subr.bf16.mxu0 %v875_v0  ;;  %721 = vmatpush3.bf16.msra.mxu1 %v817_v10  ;;  %v56_v23 = vpack.c.bf16 %v29_v22, %v29_v22  ;;  %v822_v24 = vld [vmem:[#allocation2 + $0x90] sm:$0xff]   ;;  %v823_v25 = vld [vmem:[#allocation2 + $0x98] sm:$0xff]   ;;  %v632_v26 = vld [vmem:[%s976_s2] ss:$0 sm:$0xff] }
  0x1a   :  { %722 = vmatprep.subr.bf16.mxu1 %v876_v1  ;;  %v824_v34 = vld [vmem:[#allocation2 + $0xa0] sm:$0xff]   ;;  %v825_v36 = vld [vmem:[#allocation2 + $0xa8] sm:$0xff]   ;;  %v826_v37 = vld [vmem:[#allocation2 + $0xb0] sm:$0xff]  }
  0x1b   :  { %v827_v38 = vld [vmem:[#allocation2 + $0xb8] sm:$0xff]   ;;  %v828_v39 = vld [vmem:[#allocation2 + $0xc0] sm:$0xff]   ;;  %v829_v40 = vld [vmem:[#allocation2 + $0xc8] sm:$0xff]  }
  0x1c   :  { %143 = vmatpush1.bf16.msra.mxu0 %v806_v4  ;;  %v830_v41 = vld [vmem:[#allocation2 + $0xd0] sm:$0xff]   ;;  %v831_v42 = vld [vmem:[#allocation2 + $0xd8] sm:$0xff]   ;;  %v832_v43 = vld [vmem:[#allocation2 + $0xe0] sm:$0xff]  }
  0x1d   :  { %144 = vmatprep.subr.bf16.mxu0 %v875_v0  ;;  %723 = vmatpush3.bf16.msra.mxu1 %v818_v12  ;;  %v833_v44 = vld [vmem:[#allocation2 + $0xe8] sm:$0xff]   ;;  %v834_v45 = vld [vmem:[#allocation2 + $0xf0] sm:$0xff]   ;;  %v835_v46 = vld [vmem:[#allocation2 + $0xf8] sm:$0xff]  }
  0x1e   :  { %724 = vmatprep.subr.bf16.mxu1 %v876_v1  ;;  %v836_v47 = vld [vmem:[#allocation2 + $0x100] sm:$0xff]   ;;  %v837_v48 = vld [vmem:[#allocation2 + $0x108] sm:$0xff]   ;;  %v838_v58 = vld [vmem:[#allocation2 + $0x110] sm:$0xff]  }
  0x1f   :  { %v646_v49 = vld [vmem:[%s976_s2 + $0x1] ss:$0 sm:$0xff]  ;;  %v839_v59 = vld [vmem:[#allocation2 + $0x118] sm:$0xff]   ;;  %v841_v61 = vld [vmem:[#allocation2 + $0x128] sm:$0xff]  }
  0x20   :  { %145 = vmatpush1.bf16.msra.mxu0 %v807_v5  ;;  %v840_v60 = vld [vmem:[#allocation2 + $0x120] sm:$0xff]   ;;  %v842_v62 = vld [vmem:[#allocation2 + $0x130] sm:$0xff]   ;;  %v843_v63 = vld [vmem:[#allocation2 + $0x138] sm:$0xff]  }
  0x21   :  { %146 = vmatprep.subr.bf16.mxu0 %v875_v0  ;;  %725 = vmatpush3.bf16.msra.mxu1 %v819_v14  ;;  %v845_v2 = vld [vmem:[#allocation2 + $0x148] sm:$0xff]   ;;  %v655_v3 = vld [vmem:[%s976_s2 + $0x2] ss:$0 sm:$0xff]  ;;  %v846_v12 = vld [vmem:[#allocation2 + $0x150] sm:$0xff]  }
  0x22   :  { %726 = vmatprep.subr.bf16.mxu1 %v876_v1  ;;  %v664_v14 = vld [vmem:[%s976_s2 + $0x3] ss:$0 sm:$0xff] }
  0x24   :  { %147 = vmatpush1.bf16.msra.mxu0 %v808_v9 }
  0x25   :  { %148 = vmatprep.subr.bf16.mxu0 %v875_v0  ;;  %727 = vmatpush3.bf16.msra.mxu1 %v820_v16 }
  0x26   :  { %728 = vmatprep.subr.bf16.mxu1 %v876_v1 }
  0x28   :  { %149 = vmatpush1.bf16.msra.mxu0 %v809_v11 }
  0x29   :  { %150 = vmatprep.subr.bf16.mxu0 %v875_v0  ;;  %729 = vmatpush3.bf16.msra.mxu1 %v821_v18 }
  0x2a   :  { %730 = vmatprep.subr.bf16.mxu1 %v876_v1 }
  0x2c   :  { %151 = vmatpush1.bf16.msra.mxu0 %v810_v13  ;;  %v847_v13 = vld [vmem:[#allocation2 + $0x158] sm:$0xff]  }
  0x2d   :  { %152 = vmatprep.subr.bf16.mxu0 %v875_v0  ;;  %731 = vmatpush3.bf16.msra.mxu1 %v822_v24 }
  0x2e   :  { %732 = vmatprep.subr.bf16.mxu1 %v876_v1 }
  0x30   :  { %153 = vmatpush1.bf16.msra.mxu0 %v811_v15 }
  0x31   :  { %154 = vmatprep.subr.bf16.mxu0 %v875_v0  ;;  %733 = vmatpush3.bf16.msra.mxu1 %v823_v25 }
  0x32   :  { %738 = vmatprep.subr.bf16.mxu1 %v876_v1 }
  0x34   :  { %155 = vmatpush1.bf16.msra.mxu0 %v812_v17 }
  0x35   :  { %156 = vmatprep.subr.bf16.mxu0 %v875_v0 }
  0x38   :  { %157 = vmatpush1.bf16.msra.mxu0 %v813_v19 }
  0x39   :  { %158 = vmatprep.subr.bf16.mxu0 %v875_v0 }
  0x3c   :  { %159 = vmatpush1.bf16.msra.mxu0 %v814_v20 }
  0x3d   :  { %160 = vmatprep.subr.bf16.mxu0 %v875_v0  ;;  %v844_v0 = vld [vmem:[#allocation2 + $0x140] sm:$0xff]  }
  0x40   :  { %161 = vmatpush1.bf16.msra.mxu0 %v815_v21 }
  0x41   :  { %758 = vmatprep.subr.bf16.mxu0 %v876_v1 }
  0x43   :  { %171 = vmatmul.mubr.bf16.vlgmr.msra.gmra.mrb[0].mxu0 %v56_v23  ;;  %v673_v23 = vld [vmem:[%s976_s2 + $0x4] ss:$0 sm:$0xff] }
  0x44   :  { %774 = vmatprep.mubr.msk.bf16.mxu0 %vm877_vm1, %v876_v1  ;;  %759 = vmatpush3.bf16.msra.mxu0 %v832_v43 }
  0x45   :  { %760 = vmatprep.subr.bf16.mxu0 %v876_v1 }
  0x48   :  { %761 = vmatpush3.bf16.msra.mxu0 %v833_v44 }
  0x49   :  { %762 = vmatprep.subr.bf16.mxu0 %v876_v1 }
  0x4c   :  { %763 = vmatpush3.bf16.msra.mxu0 %v834_v45 }
  0x4d   :  { %764 = vmatprep.subr.bf16.mxu0 %v876_v1 }
  0x50   :  { %765 = vmatpush3.bf16.msra.mxu0 %v835_v46 }
  0x51   :  { %766 = vmatprep.subr.bf16.mxu0 %v876_v1 }
  0x54   :  { %767 = vmatpush3.bf16.msra.mxu0 %v836_v47 }
  0x55   :  { %768 = vmatprep.subr.bf16.mxu0 %v876_v1 }
  0x58   :  { %769 = vmatpush3.bf16.msra.mxu0 %v837_v48 }
  0x59   :  { %770 = vmatprep.subr.bf16.mxu0 %v876_v1 }
  0x5c   :  { %771 = vmatpush3.bf16.msra.mxu0 %v838_v58 }
  0x5d   :  { %772 = vmatprep.subr.bf16.mxu0 %v876_v1 }
  0x60   :  { %773 = vmatpush3.bf16.msra.mxu0 %v839_v59 }
 0x116   :  { %v172_v27 = vpop.f32.mrb[0].mxu0 }
 0x117   :  { %v173_v28 = vadd.f32 %v632_v26, %v172_v27  ;;  %v174_v29 = vpop.f32.mrb[1].mxu0 }
 0x118   :  { %v175_v30 = vpop.f32.mrb[2].mxu0 }
 0x119   :  { %v178_v31 = vmul.f32 0.2, %v173_v28  ;;  %v176_v32 = vpop.f32.mrb[3].mxu0 }
 0x11b   :  { %v179_v33 = vmax.f32 %v173_v28, %v178_v31 }
 0x11d   :  { %v197_v35 = vpack.c.bf16 %v179_v33, %v179_v33 }
 0x11f   :  { %735 = vmatmul.mubr.bf16.vlgmr.msra.gmra.mrb[0].mxu1 %v197_v35 }
 0x120   :  { %739 = vmatpush3.bf16.msra.mxu1 %v824_v34  ;;  %754 = vmatprep.mubr.msk.bf16.mxu1 %vm877_vm1, %v876_v1 }
 0x121   :  { %740 = vmatprep.subr.bf16.mxu1 %v876_v1 }
 0x124   :  { %741 = vmatpush3.bf16.msra.mxu1 %v825_v36 }
 0x125   :  { %742 = vmatprep.subr.bf16.mxu1 %v876_v1 }
 0x128   :  { %743 = vmatpush3.bf16.msra.mxu1 %v826_v37 }
 0x129   :  { %744 = vmatprep.subr.bf16.mxu1 %v876_v1 }
 0x12c   :  { %745 = vmatpush3.bf16.msra.mxu1 %v827_v38 }
 0x12d   :  { %746 = vmatprep.subr.bf16.mxu1 %v876_v1 }
 0x130   :  { %747 = vmatpush3.bf16.msra.mxu1 %v828_v39 }
 0x131   :  { %748 = vmatprep.subr.bf16.mxu1 %v876_v1 }
 0x134   :  { %749 = vmatpush3.bf16.msra.mxu1 %v829_v40 }
 0x135   :  { %750 = vmatprep.subr.bf16.mxu1 %v876_v1 }
 0x138   :  { %751 = vmatpush3.bf16.msra.mxu1 %v830_v41 }
 0x139   :  { %752 = vmatprep.subr.bf16.mxu1 %v876_v1 }
 0x13c   :  { %753 = vmatpush3.bf16.msra.mxu1 %v831_v42 }
 0x13d   :  { %778 = vmatprep.subr.bf16.mxu1 %v876_v1 }
 0x1f2   :  { %v284_v50 = vpop.f32.mrb[0].mxu1 }
 0x1f3   :  { %v285_v51 = vadd.f32 %v646_v49, %v284_v50  ;;  %v736_v52 = vpop.f32.mrb[1].mxu1 }
 0x1f4   :  { %v287_v53 = vpop.f32.mrb[2].mxu1 }
 0x1f5   :  { %v290_v54 = vmul.f32 0.2, %v285_v51  ;;  %v737_v55 = vpop.f32.mrb[3].mxu1 }
 0x1f7   :  { %v291_v56 = vmax.f32 %v285_v51, %v290_v54 }
 0x1f9   :  { %v309_v57 = vpack.c.bf16 %v291_v56, %v291_v56 }
 0x1fb   :  { %755 = vmatmul.mubr.bf16.vlgmr.msra.gmra.mrb[4].mxu1 %v309_v57 }
 0x1fc   :  { %794 = vmatprep.mubr.msk.bf16.mxu1 %vm877_vm1, %v876_v1  ;;  %779 = vmatpush3.bf16.msra.mxu1 %v840_v60 }
 0x1fd   :  { %780 = vmatprep.subr.bf16.mxu1 %v876_v1 }
 0x200   :  { %781 = vmatpush3.bf16.msra.mxu1 %v841_v61 }
 0x201   :  { %782 = vmatprep.subr.bf16.mxu1 %v876_v1 }
 0x204   :  { %783 = vmatpush3.bf16.msra.mxu1 %v842_v62 }
 0x205   :  { %784 = vmatprep.subr.bf16.mxu1 %v876_v1 }
 0x208   :  { %785 = vmatpush3.bf16.msra.mxu1 %v843_v63 }
 0x209   :  { %786 = vmatprep.subr.bf16.mxu1 %v876_v1 }
 0x20c   :  { %787 = vmatpush3.bf16.msra.mxu1 %v844_v0 }
 0x20d   :  { %788 = vmatprep.subr.bf16.mxu1 %v876_v1 }
 0x210   :  { %789 = vmatpush3.bf16.msra.mxu1 %v845_v2 }
 0x211   :  { %790 = vmatprep.subr.bf16.mxu1 %v876_v1 }
 0x214   :  { %791 = vmatpush3.bf16.msra.mxu1 %v846_v12 }
 0x215   :  { %792 = vmatprep.subr.bf16.mxu1 %v876_v1 }
 0x218   :  { %793 = vmatpush3.bf16.msra.mxu1 %v847_v13 }
 0x2ce   :  { %v396_v4 = vpop.f32.mrb[4].mxu1 }
 0x2cf   :  { %v397_v5 = vadd.f32 %v655_v3, %v396_v4  ;;  %v756_v6 = vpop.f32.mrb[5].mxu1 }
 0x2d0   :  { %v399_v7 = vpop.f32.mrb[6].mxu1 }
 0x2d1   :  { %v402_v8 = vmul.f32 0.2, %v397_v5  ;;  %v757_v9 = vpop.f32.mrb[7].mxu1 }
 0x2d3   :  { %v403_v10 = vmax.f32 %v397_v5, %v402_v8 }
 0x2d5   :  { %v421_v11 = vpack.c.bf16 %v403_v10, %v403_v10 }
 0x2d7   :  { %775 = vmatmul.mubr.bf16.vlgmr.msra.gmra.mrb[4].mxu0 %v421_v11 }
 0x3aa   :  { %v508_v15 = vpop.f32.mrb[4].mxu0 }
 0x3ab   :  { %v509_v16 = vadd.f32 %v664_v14, %v508_v15  ;;  %v776_v17 = vpop.f32.mrb[5].mxu0 }
 0x3ac   :  { %v511_v18 = vpop.f32.mrb[6].mxu0 }
 0x3ad   :  { %v514_v19 = vmul.f32 0.2, %v509_v16  ;;  %v777_v20 = vpop.f32.mrb[7].mxu0 }
 0x3af   :  { %v515_v21 = vmax.f32 %v509_v16, %v514_v19 }
 0x3b1   :  { %v533_v22 = vpack.c.bf16 %v515_v21, %v515_v21 }
 0x3b3   :  { %795 = vmatmul.mubr.bf16.vlgmr.msra.gmra.mrb[8].mxu1 %v533_v22 }
 0x486   :  { %v620_v1 = vpop.f32.mrb[8].mxu1 }
 0x487   :  { %v621_v24 = vadd.f32 %v673_v23, %v620_v1  ;;  %v796_v25 = vpop.f32.mrb[9].mxu1 }
 0x488   :  { %v623_v26 = vpop.f32.mrb[10].mxu1 }
 0x489   :  { %626 = vst [vmem:[%s977_s3] sm:$0xff] %v621_v24  ;;  %v797_v27 = vpop.f32.mrb[11].mxu1 }
 0x48a   :  { %631 = vsyncpa [#allocation3], 1 }

</bundles_post_ra>
